<compile_context>
chip_gen: v7x
topology: tpu7x:2x2x1
jax: 0.10.0
libtpu: 0.0.40
codegen_flags: <defaults>
</compile_context>

<pallas_src>
import functools

import jax
import jax.numpy as jnp
from jax import lax
from jax.experimental import pallas as pl
from jax.experimental.pallas import tpu as pltpu

_LANE = 128
_SUBLANE = 8

# Keep the double-buffered output block comfortably inside every generation's
# scoped VMEM (v7x has only 64 MiB physical VMEM; v5e/v6e have 128 MiB).
_OUT_VMEM_BUDGET = 24 << 20
_VMEM_LIMIT_CAP = 48 << 20

# Small-vocab fast path thresholds (table resident in VMEM, one-hot MXU gather).
_VMEM_TABLE_MAX_BYTES = 4 << 20
_VMEM_TABLE_MAX_VOCAB = 2048


def _round_up(x, m):
    return ((x + m - 1) // m) * m


def _vmem_limit(nbytes):
    return int(min(max(nbytes + (4 << 20), 16 << 20), _VMEM_LIMIT_CAP))


def pad_embedding_table(weight):
    """Pad the hidden dim up to a multiple of 128 (lane-dense output stores).

    Call ONCE when the parameters are created/loaded -- not per forward call.
    """
    v, h = weight.shape
    h_pad = _round_up(h, _LANE)
    if h_pad != h:
        weight = jnp.pad(weight, ((0, 0), (0, h_pad - h)))
    return weight


# -----------------------------------------------------------------------------
# Path 1 (large vocab): table stays in HBM; one row-gather DMA per token lands
# directly in the output block.  Cost is O(N * H) bytes, vocab independent.
# -----------------------------------------------------------------------------
def _hbm_gather_kernel(ids_hbm, table_hbm, out_ref, ids_smem, ids_sem, row_sem,
                       *, n_tokens):
    # ids_hbm:   (N_pad,)        int32 token ids, left in HBM (pl.ANY)
    # table_hbm: (V, H_pad)      embedding table, left in HBM (pl.ANY)
    # out_ref:   (TILE, H_pad)   output block (VMEM) -- gather DMAs land here
    # ids_smem:  (TILE,)         SMEM scratch for this tile's ids
    # ids_sem / row_sem:         DMA semaphores
    tile = out_ref.shape[0]
    base = pl.program_id(0) * tile

    # Fetch only this tile's ids into SMEM (TILE * 4 bytes) -- scales to any
    # token-stream length, unlike scalar-prefetching all N ids.
    ids_cp = pltpu.make_async_copy(ids_hbm.at[pl.ds(base, tile)], ids_smem, ids_sem)
    ids_cp.start()
    ids_cp.wait()

    def row_copy(t):
        # Identical descriptor is used for start and wait -> byte counts match
        # by construction (no dummy row-0 source).
        return pltpu.make_async_copy(
            table_hbm.at[pl.ds(ids_smem[t], 1), :],
            out_ref.at[pl.ds(t, 1), :],
            row_sem,
        )

    def issue(t, carry):
        @pl.when(base + t < n_tokens)        # skip padding rows of the last tile
        def _():
            row_copy(t).start()
        return carry

    def drain(t, carry):
        @pl.when(base + t < n_tokens)
        def _():
            row_copy(t).wait()
        return carry

    # Issue every row gather for the tile first (all in flight), then drain.
    lax.fori_loop(0, tile, issue, 0, unroll=8)
    lax.fori_loop(0, tile, drain, 0, unroll=8)


# -----------------------------------------------------------------------------
# Path 2 (small vocab): whole (V, H_pad) table resident in VMEM across grid
# steps; gather via one-hot MXU matmul (loads the table once per kernel,
# not once per token).
# -----------------------------------------------------------------------------
def _vmem_onehot_kernel(ids_ref, table_ref, out_ref):
    # ids_ref:   (TILE, 1)      int32 (VMEM block)
    # table_ref: (V, H_pad)     table, resident (constant index_map)
    # out_ref:   (TILE, H_pad)
    tile = out_ref.shape[0]
    v = table_ref.shape[0]
    one_hot = (ids_ref[...] ==
               lax.broadcasted_iota(jnp.int32, (tile, v), 1)).astype(table_ref.dtype)
    out_ref[...] = jnp.dot(
        one_hot, table_ref[...],
        preferred_element_type=jnp.float32,
        precision=jax.lax.Precision.HIGHEST,   # exact selection of f32 rows
    ).astype(out_ref.dtype)


def embedding_forward(x, padded_weight, hidden_dim, pad_token_id, *,
                      token_tile=256, use_vmem_table=None):
    """x: (B, S) int32 ids; padded_weight: (V, H_pad) from pad_embedding_table.

    Returns (B, S, hidden_dim) float embeddings == nn.Embedding forward.
    """
    b, s = x.shape
    v, h_pad = padded_weight.shape
    assert h_pad % _LANE == 0, "run the weight through pad_embedding_table() once"
    assert hidden_dim <= h_pad
    n = b * s
    itemsize = padded_weight.dtype.itemsize
    bytes_per_row = h_pad * itemsize

    # Tile as large as the VMEM budget allows (amortizes per-step overhead and
    # keeps more row DMAs in flight); clamp for tiny inputs.
    granule = _LANE if n >= _LANE else _SUBLANE
    max_tile = max(granule,
                   (_OUT_VMEM_BUDGET // (2 * bytes_per_row)) // granule * granule)
    token_tile = int(min(_round_up(token_tile, granule), max_tile,
                         _round_up(n, granule)))
    n_pad = _round_up(n, token_tile)
    grid = (n_pad // token_tile,)

    # Flatten + pad the token stream; padded rows use pad_token_id (a valid
    # row), are skipped by the HBM path and sliced off below either way.
    ids_flat = x.reshape(n).astype(jnp.int32)
    if n_pad != n:
        ids_flat = jnp.concatenate(
            [ids_flat, jnp.full((n_pad - n,), pad_token_id, dtype=jnp.int32)])

    if use_vmem_table is None:
        use_vmem_table = (v <= _VMEM_TABLE_MAX_VOCAB
                          and v * bytes_per_row <= _VMEM_TABLE_MAX_BYTES)

    if use_vmem_table:
        vmem_needed = (2 * token_tile * bytes_per_row     # double-buffered output
                       + 2 * v * bytes_per_row            # resident table
                       + token_tile * v * itemsize        # one-hot intermediate
                       + 2 * token_tile * 4)              # id blocks
        out = pl.pallas_call(
            _vmem_onehot_kernel,
            out_shape=jax.ShapeDtypeStruct((n_pad, h_pad), padded_weight.dtype),
            grid=grid,
            in_specs=[
                pl.BlockSpec((token_tile, 1), lambda i: (i, 0)),
                pl.BlockSpec((v, h_pad), lambda i: (0, 0)),     # table resident
            ],
            out_specs=pl.BlockSpec((token_tile, h_pad), lambda i: (i, 0)),
            compiler_params=pltpu.CompilerParams(
                dimension_semantics=("parallel",),
                vmem_limit_bytes=_vmem_limit(vmem_needed),
            ),
        )(ids_flat.reshape(n_pad, 1), padded_weight)
    else:
        vmem_needed = 2 * token_tile * bytes_per_row       # double-buffered output
        kernel = functools.partial(_hbm_gather_kernel, n_tokens=n)
        out = pl.pallas_call(
            kernel,
            out_shape=jax.ShapeDtypeStruct((n_pad, h_pad), padded_weight.dtype),
            grid=grid,
            in_specs=[
                pl.BlockSpec(memory_space=pl.ANY),          # ids stay in HBM
                pl.BlockSpec(memory_space=pl.ANY),          # table stays in HBM
            ],
            out_specs=pl.BlockSpec((token_tile, h_pad), lambda i: (i, 0)),
            scratch_shapes=[
                pltpu.SMEM((token_tile,), jnp.int32),
                pltpu.SemaphoreType.DMA(()),
                pltpu.SemaphoreType.DMA(()),
            ],
            compiler_params=pltpu.CompilerParams(
                dimension_semantics=("parallel",),          # megacore-shardable
                vmem_limit_bytes=_vmem_limit(vmem_needed),
            ),
        )(ids_flat, padded_weight)

    return out[:n, :hidden_dim].reshape(b, s, hidden_dim)


class Embeddings:
    """JAX/Pallas equivalent of the PyTorch Embeddings module."""

    def __init__(self, vocab_size, hidden_dim, pad_token_id, key):
        self.vocab_size = vocab_size
        self.hidden_dim = hidden_dim
        self.pad_token_id = pad_token_id
        # nn.Embedding default init: N(0, 1), padding_idx row zeroed.
        w = jax.random.normal(key, (vocab_size, hidden_dim), dtype=jnp.float32)
        self.weight = w.at[pad_token_id].set(0.0)
        # Lane-dense padding done ONCE here, never inside the forward pass.
        self.padded_weight = pad_embedding_table(self.weight)

    def __call__(self, x, **kwargs):
        return embedding_forward(x, self.padded_weight, self.hidden_dim,
                                 self.pad_token_id, **kwargs)


if __name__ == "__main__":
    vocab_size = 32
    hidden_dim = 32
    pad_token_id = 0
    batch, seq = 2, 8

    key = jax.random.PRNGKey(0)
    k_tab, k_ids = jax.random.split(key)

    emb = Embeddings(vocab_size, hidden_dim, pad_token_id, k_tab)
    x = jax.random.randint(k_ids, (batch, seq), 0, vocab_size, dtype=jnp.int32)
    x = x.at[0, 0].set(pad_token_id)      # ensure a pad token is present

    # Reference: plain JAX gather (== nn.Embedding forward).
    ref = jnp.take(emb.weight, x, axis=0)

    # Small-vocab fast path (table resident in VMEM, one-hot MXU gather).
    out_fast = jax.block_until_ready(emb(x))
    # Large-vocab path (per-row HBM DMA gather) forced on the same inputs.
    out_dma = jax.block_until_ready(emb(x, use_vmem_table=False))

    for out in (out_fast, out_dma):
        assert out.shape == (batch, seq, hidden_dim)
        assert jnp.all(out[0, 0] == 0.0), "padding_idx row must be zero"
    assert jnp.array_equal(out_dma, ref), "DMA-gather path mismatch vs reference"
    assert jnp.allclose(out_fast, ref, rtol=0.0, atol=1e-6), \
        "VMEM fast path mismatch vs reference"

    print("KERNEL_OK")
</pallas_src>

<mosaic_0001>
module attributes {stable_mosaic.version = 11 : i64} {
  func.func @_vmem_onehot_kernel(%arg0: i32, %arg1: memref<16x1xi32, #tpu.memory_space<vmem>>, %arg2: memref<32x128xf32, #tpu.memory_space<vmem>>, %arg3: memref<16x128xf32, #tpu.memory_space<vmem>>) attributes {dimension_semantics = [#tpu.dimension_semantics<parallel>], iteration_bounds = array<i64: 1>, scalar_prefetch = 0 : i64, scratch_operands = 0 : i64, tpu.core_type = #tpu.core_type<tc>, window_params = [{transform_indices = @transform_0, window_bounds = array<i64: 16, 1>}, {pipeline_mode = #tpu.pipeline_mode<synchronous>, transform_indices = @transform_1, window_bounds = array<i64: 32, 128>}, {transform_indices = @transform_2, window_bounds = array<i64: 16, 128>}]} {
    %c0 = arith.constant 0 : index
    %c0_0 = arith.constant 0 : index
    %0 = vector.load %arg1[%c0, %c0_0] : memref<16x1xi32, #tpu.memory_space<vmem>>, vector<16x1xi32>
    %1 = tpu.iota {dimensions = array<i32: 1>} : vector<16x32xi32>
    %2 = vector.broadcast %0 : vector<16x1xi32> to vector<16x32xi32>
    %3 = arith.cmpi eq, %2, %1 : vector<16x32xi32>
    %4 = arith.extui %3 : vector<16x32xi1> to vector<16x32xi32>
    %5 = arith.sitofp %4 : vector<16x32xi32> to vector<16x32xf32>
    %c0_1 = arith.constant 0 : index
    %c0_2 = arith.constant 0 : index
    %6 = vector.load %arg2[%c0_1, %c0_2] : memref<32x128xf32, #tpu.memory_space<vmem>>, vector<32x128xf32>
    %cst = arith.constant dense<0.000000e+00> : vector<16x128xf32>
    %7 = tpu.matmul %5, %6, %cst {dimension_numbers = #tpu.dot_dimension_numbers<[1], [0], [0], [1], [0, 0, 1, 1], [], []>, precision = #tpu.contract_precision<fp32>} : vector<16x32xf32>, vector<32x128xf32>, vector<16x128xf32> -> vector<16x128xf32>
    %c0_3 = arith.constant 0 : index
    %c0_4 = arith.constant 0 : index
    %8 = vector.load %arg3[%c0_3, %c0_4] : memref<16x128xf32, #tpu.memory_space<vmem>>, vector<16x128xf32>
    tpu.vector_store %arg3[%c0_3, %c0_4], %7 {strides = array<i32>} : memref<16x128xf32, #tpu.memory_space<vmem>>, vector<16x128xf32>,
    return
  }
  func.func @transform_0(%arg0: i32) -> (i32, i32) {
    %c0_i32 = arith.constant 0 : i32
    %c0_i32_0 = arith.constant 0 : i32
    return %arg0, %c0_i32 : i32, i32
  }
  func.func @transform_1(%arg0: i32) -> (i32, i32) {
    %c0_i32 = arith.constant 0 : i32
    %c0_i32_0 = arith.constant 0 : i32
    %c0_i32_1 = arith.constant 0 : i32
    return %c0_i32, %c0_i32_0 : i32, i32
  }
  func.func @transform_2(%arg0: i32) -> (i32, i32) {
    %c0_i32 = arith.constant 0 : i32
    %c0_i32_0 = arith.constant 0 : i32
    return %arg0, %c0_i32 : i32, i32
  }
}

</mosaic_0001>

<bundles_post_ra>
// kernel: tpu_custom_call.1
= control target key start
LH: loop header
LB: loop body
LE: loop exit
PB: predicated region body
PF: predicated region fallthrough
CT: control target
= control target key end

     0   :  { %7 = vsyncpa [#allocation3], 0  ;;  %s904_s0 = inlined_call_operand.vmem [shape: s32[16,1], index: 0, kind: input, shape index: {}]   ;;  %s905_s1 = inlined_call_operand.hbm [shape: f32[32,128], index: 1, kind: input, shape index: {}]   ;;  %s906_s2 = inlined_call_operand.hbm [shape: f32[16,128], index: 2, kind: output, shape index: {}]  }
   0x1   :  { %8 = vsyncpa [#allocation4], 0  ;;  %s823_s9 = smov [#allocation2]   ;;  %s775_s13 = scalar_lea.hbm %s905_s1, 512 }
   0x2   :  { %s16_s10 = sshll.u32 %s823_s9, 4  ;;  %p776_p0 = scmp.ne.s32.totalorder %s905_s1, %s775_s13  ;;  %s17_s10 = int_to_ptr.vmem [resolvable:$true] %s16_s10 }
   0x3   :  { %p779_p1 = scmp.lt.u32.totalorder %s775_s13, %s905_s1 }
   0x5   :  { %p781_p2 = pnand %p779_p1, %p776_p0 }
   0x7   :  { %784 = shalt.err (!%p781_p2)
}
   0x8   :  { %s785_s18 = scalar_lea.vmem %s17_s10, 512  ;;  %p790_p4 = scmp.lt.s32.totalorder %s17_s10, %s17_s10 }
   0x9   :  { %p786_p3 = scmp.ne.s32.totalorder %s17_s10, %s785_s18  ;;  %p791_p5 = scmp.lt.s32.totalorder %s785_s18, %s785_s18 }
   0xb   :  { %p792_p6 = por %p791_p5, %p790_p4 }
   0xd   :  { %p793_p7 = pnand %p792_p6, %p786_p3 }
   0xf   :  { %796 = shalt.err (!%p793_p7)
}
  0x10   :  { %s824_s19 = smov 128   ;;  %s825_s20 = smov 8  }
  0x11   :  { %22 = dma.hbm_to_vmem [thread:$0]  %s905_s1, 512, %s17_s10, [#allocation3], %s824_s19, %s824_s19, %s825_s20  }
  0x12   :  { %819 = dma.done.wait [#allocation3], 512  }
  0x13   :  { %820 = vsyncadd [#allocation3], 4294966784  ;;  %v826_v0 = vmov 0   ;;  %v26_v1 = vld [vmem:[%s904_s0] sm:$0xff]  ;;  %v43_v3 = vld [vmem:[#allocation2 + $0x8] sm:$0xff]  ;;  %v28_v35 = vlaneseq  ;;  %vm46_vm0 = vcmask 261120  }
  0x14   :  { %774 = vset.pattern.permute.xlu0 %v826_v0  ;;  %v42_v2 = vld [vmem:[#allocation2] sm:$0xff]  ;;  %v27_v5 = vld [vmem:[%s904_s0 + $0x8] sm:$0xff]  ;;  %v57_v6 = vand.u32 4294901760, %v43_v3  ;;  %v44_v7 = vld [vmem:[#allocation2 + $0x10] sm:$0xff]  ;;  %v827_v38 = vmov 0.0   ;;  %s828_s0 = smov [#allocation5]  }
  0x15   :  { %31 = vperm.xlu0 %774, %v26_v1   ;;  %v54_v4 = vand.u32 4294901760, %v42_v2  ;;  %v45_v8 = vld [vmem:[#allocation2 + $0x18] sm:$0xff]  ;;  %v60_v10 = vand.u32 4294901760, %v44_v7  ;;  %v29_v36 = vand.u32 127, %v28_v35  ;;  %s588_s1 = sshll.u32 %s828_s0, 4  ;;  %s589_s1 = int_to_ptr.vmem [resolvable:$true] %s588_s1 }
  0x16   :  { %v63_v11 = vand.u32 4294901760, %v45_v8  ;;  %v151_v14 = vsub.f32 %v43_v3, %v57_v6  ;;  %s797_s27 = scalar_lea.vmem %s589_s1, 256  ;;  %p802_p9 = scmp.lt.s32.totalorder %s589_s1, %s589_s1 }
  0x17   :  { %v865_v9 = vpack.c.bf16 %v57_v6, %v54_v4  ;;  %v144_v13 = vsub.f32 %v42_v2, %v54_v4  ;;  %v158_v20 = vsub.f32 %v44_v7, %v60_v10  ;;  %p798_p8 = scmp.ne.s32.totalorder %s589_s1, %s797_s27  ;;  %p803_p10 = scmp.lt.s32.totalorder %s797_s27, %s797_s27 }
  0x18   :  { %v869_v12 = vpack.c.bf16 %v63_v11, %v60_v10  ;;  %v152_v16 = vand.u32 4294901760, %v151_v14  ;;  %v165_v21 = vsub.f32 %v45_v8, %v63_v11 }
  0x19   :  { %34 = vperm.xlu0 %774, %v27_v5   ;;  %735 = vmatprep.subr.bf16.mxu0 %v865_v9  ;;  %v145_v15 = vand.u32 4294901760, %v144_v13  ;;  %v159_v24 = vand.u32 4294901760, %v158_v20  ;;  %v726_v33 = vpack.c.bf16 %v151_v14, %v144_v13  ;;  %p804_p11 = por %p803_p10, %p802_p9 }
  0x1a   :  { %711 = vmatprep.subr.bf16.mxu1 %v865_v9  ;;  %737 = vmatpush3.bf16.msra.mxu0 %v865_v9  ;;  %v153_v19 = vsub.f32 %v151_v14, %v152_v16  ;;  %v166_v25 = vand.u32 4294901760, %v165_v21  ;;  %v730_v34 = vpack.c.bf16 %v165_v21, %v158_v20 }
  0x1b   :  { %713 = vmatpush3.bf16.msra.mxu1 %v865_v9  ;;  %739 = vmatprep.subr.bf16.mxu0 %v869_v12  ;;  %v742_v17 = vpack.c.bf16 %v152_v16, %v145_v15  ;;  %v146_v18 = vsub.f32 %v144_v13, %v145_v15  ;;  %v160_v28 = vsub.f32 %v158_v20, %v159_v24  ;;  %p805_p12 = pnand %p804_p11, %p798_p8 }
  0x1c   :  { %715 = vmatprep.subr.bf16.mxu1 %v869_v12  ;;  %v154_v23 = vand.u32 4294901760, %v153_v19  ;;  %v746_v27 = vpack.c.bf16 %v166_v25, %v159_v24  ;;  %v167_v29 = vsub.f32 %v165_v21, %v166_v25 }
  0x1d   :  { %v147_v22 = vand.u32 4294901760, %v146_v18  ;;  %v161_v30 = vand.u32 4294901760, %v160_v28 }
  0x1e   :  { %741 = vmatpush3.bf16.msra.mxu0 %v869_v12  ;;  %v168_v31 = vand.u32 4294901760, %v167_v29 }
  0x1f   :  { %717 = vmatpush3.bf16.msra.mxu1 %v869_v12  ;;  %743 = vmatprep.subr.bf16.mxu0 %v742_v17  ;;  %v718_v26 = vpack.c.bf16 %v154_v23, %v147_v22 }
  0x20   :  { %v722_v32 = vpack.c.bf16 %v168_v31, %v161_v30 }
  0x21   :  { %719 = vmatprep.subr.bf16.mxu1 %v718_v26 }
  0x94   :  { %v32_v37 = vpop.permute.xlu0 %31 }
  0x95   :  { %vm36_vm1 = vcmp.eq.s32.totalorder %v32_v37, %v29_v36 }
  0x96   :  { %v600_v39 = vsel %vm36_vm1, 1.0, %v827_v38 }
  0x97   :  { %v48_v40 = vsel %vm46_vm0, %v600_v39, 0 }
  0x98   :  { %v123_v41 = vsub.f32 %v48_v40, %v48_v40  ;;  %v35_v42 = vpop.permute.xlu0 %34 }
  0x99   :  { %vm37_vm2 = vcmp.eq.s32.totalorder %v35_v42, %v29_v36 }
  0x9a   :  { %v601_v43 = vsel %vm37_vm2, 1.0, %v827_v38  ;;  %v124_v44 = vand.u32 4294901760, %v123_v41 }
  0x9b   :  { %v51_v45 = vsel %vm46_vm0, %v601_v43, 0 }
  0x9c   :  { %v133_v46 = vsub.f32 %v51_v45, %v51_v45  ;;  %685 = vmatprep.mubr.f32.mxu0 %v124_v44  ;;  %v125_v47 = vsub.f32 %v123_v41, %v124_v44 }
  0x9e   :  { %v126_v48 = vand.u32 4294901760, %v125_v47  ;;  %v134_v49 = vand.u32 4294901760, %v133_v46 }
  0xa0   :  { %652 = vmatprep.mubr.f32.mxu1 %v126_v48  ;;  %686 = vmatmul.mubr.f32.vlgmr.msra.gmra.mrb[0].mxu0 %v134_v49  ;;  %v135_v50 = vsub.f32 %v133_v46, %v134_v49 }
  0xa1   :  { %745 = vmatpush3.bf16.msra.mxu0 %v742_v17  ;;  %696 = vmatprep.mubr.msk.f32.mxu0 %vm46_vm0, %v600_v39 }
  0xa2   :  { %v136_v51 = vand.u32 4294901760, %v135_v50  ;;  %747 = vmatprep.subr.bf16.mxu0 %v746_v27 }
  0xa4   :  { %653 = vmatmul.mubr.f32.vlgmr.msra.gmra.mrb[0].mxu1 %v136_v51 }
  0xa5   :  { %721 = vmatpush3.bf16.msra.mxu1 %v718_v26  ;;  %663 = vmatprep.mubr.msk.f32.mxu1 %vm46_vm0, %v600_v39 }
  0xa6   :  { %749 = vmatpush3.bf16.msra.mxu0 %v746_v27  ;;  %723 = vmatprep.subr.bf16.mxu1 %v722_v32 }
  0xa7   :  { %751 = vmatprep.subr.bf16.mxu0 %v865_v9 }
  0xa9   :  { %725 = vmatpush3.bf16.msra.mxu1 %v722_v32  ;;  %697 = vmatmul.mubr.msk.f32.vlgmr.msra.gmra.mrb[0].mxu0 %vm46_vm0, %v601_v43 }
  0xaa   :  { %753 = vmatpush3.bf16.msra.mxu0 %v865_v9  ;;  %707 = vmatprep.mubr.msk.f32.mxu0 %vm46_vm0, %v600_v39 }
  0xab   :  { %727 = vmatprep.subr.bf16.mxu1 %v726_v33  ;;  %755 = vmatprep.subr.bf16.mxu0 %v869_v12 }
  0xac   :  { %664 = vmatmul.mubr.msk.f32.vlgmr.msra.gmra.mrb[0].mxu1 %vm46_vm0, %v601_v43 }
  0xad   :  { %729 = vmatpush3.bf16.msra.mxu1 %v726_v33  ;;  %674 = vmatprep.mubr.f32.mxu1 %v123_v41 }
  0xae   :  { %757 = vmatpush3.bf16.msra.mxu0 %v869_v12  ;;  %731 = vmatprep.subr.bf16.mxu1 %v730_v34 }
  0xb1   :  { %733 = vmatpush3.bf16.msra.mxu1 %v730_v34  ;;  %708 = vmatmul.mubr.msk.f32.vlgmr.msra.gmra.mrb[0].mxu0 %vm46_vm0, %v601_v43 }
  0xb4   :  { %675 = vmatmul.mubr.f32.vlgmr.msra.gmra.mrb[0].mxu1 %v133_v46 }
 0x184   :  { %v709_v52 = vpop.f32.mrb[0].mxu0 }
 0x185   :  { %v571_v53 = vpop.f32.mrb[1].mxu0 }
 0x187   :  { %v676_v54 = vpop.f32.mrb[0].mxu1 }
 0x188   :  { %v758_v55 = vadd.f32 %v709_v52, %v676_v54  ;;  %v315_v56 = vpop.f32.mrb[1].mxu1 }
 0x189   :  { %v759_v57 = vadd.f32 %v571_v53, %v315_v56 }
 0x18a   :  { %582 = vst [vmem:[#allocation5 + $0x8] sm:$0xff] %v758_v55 }
 0x18b   :  { %581 = vst [vmem:[#allocation5] sm:$0xff] %v759_v57 }
 0x18c   :  { %808 = shalt.err (!%p805_p12)
}
 0x18d   :  { %s809_s30 = scalar_lea.hbm %s906_s2, 256 }
 0x18e   :  { %p810_p13 = scmp.ne.s32.totalorder %s906_s2, %s809_s30  ;;  %p813_p0 = scmp.lt.u32.totalorder %s809_s30, %s906_s2 }
 0x190   :  { %p815_p1 = pnand %p813_p0, %p810_p13 }
 0x192   :  { %818 = shalt.err (!%p815_p1)
}
 0x193   :  { %594 = dma.vmem_to_hbm [thread:$0]  %s589_s1, 256, %s906_s2, [#allocation4], %s824_s19, %s824_s19, %s825_s20  }
 0x194   :  { %821 = dma.done.wait [#allocation4], 256  }
 0x195   :  { %822 = vsyncadd [#allocation4], 4294967040 }
 0x196   :  { %598 = vsyncpa [#allocation3], 1 }
 0x197   :  { %599 = vsyncpa [#allocation4], 1 }

</bundles_post_ra>
